<compile_context>
chip_gen: v6e
topology: v6e:2x2x1
jax: 0.10.0
libtpu: 0.0.40
codegen_flags: <defaults>
</compile_context>

<pallas_src>
import jax
import jax.numpy as jnp
from jax.experimental import pallas as pl
from jax.experimental.pallas import tpu as pltpu


def _round_up(x, m):
    return (x + m - 1) // m * m


# -----------------------------------------------------------------------------
# Path 1: small vocab -- row-tiled one-hot @ table on the MXU.
# -----------------------------------------------------------------------------
def _onehot_matmul_kernel(idx_ref, table_ref, out_ref):
    # idx_ref:   (TM, 1) int32       -- token ids for this row tile
    # table_ref: (Vp, Vp) f32/bf16   -- embedding weight (VMEM-resident)
    # out_ref:   (TM, Vp)            -- gathered embeddings for this row tile
    tm, v = out_ref.shape
    col = jax.lax.broadcasted_iota(jnp.int32, (tm, v), 1)
    # One-hot in the table's dtype so a bf16 table takes the native bf16 MXU
    # path; the result is an exact row copy either way.
    onehot = (col == idx_ref[...]).astype(table_ref.dtype)
    out_ref[...] = jnp.dot(
        onehot, table_ref[...], preferred_element_type=jnp.float32
    ).astype(out_ref.dtype)


def _choose_row_tile(n, max_tile=1024):
    """Adaptive row tile: single step when it fits, else cap padding waste."""
    n8 = _round_up(n, 8)
    if n8 <= max_tile:
        return n8  # single grid step, <= 7 rows of padding
    for tm in (1024, 512, 256, 128, 64, 32, 16, 8):
        if tm > max_tile:
            continue
        if _round_up(n, tm) - n <= max(n // 4, 7):
            return tm
    return 8


def _embed_matmul(idx_flat, table, max_row_tile=1024):
    n = idx_flat.shape[0]
    v = table.shape[0]  # already padded to a multiple of 128 by the wrapper
    tm = _choose_row_tile(n, max_row_tile)
    n_pad = _round_up(n, tm)
    # Padded rows gather table row 0 and are sliced off below.
    idx_p = jnp.pad(idx_flat, (0, n_pad - n)).reshape(n_pad, 1)

    out = pl.pallas_call(
        _onehot_matmul_kernel,
        out_shape=jax.ShapeDtypeStruct((n_pad, v), table.dtype),
        grid=(n_pad // tm,),
        in_specs=[
            # Per-tile token ids.  NOTE: the (TM, 1) int32 block is lane
            # padded ~128x in VMEM (~0.5 MiB/buffer at TM=1024) -- accounted
            # for in the VMEM budget, still tiny next to the out buffers.
            pl.BlockSpec((tm, 1), lambda i: (i, 0)),
            # Whole table with a constant block index -> VMEM-resident across
            # the row axis (no re-DMA per tile).  Only used for V <= 256, so
            # the resident table is <= 256 KiB even on v7x (64 MiB VMEM).
            pl.BlockSpec((v, v), lambda i: (0, 0)),
        ],
        out_specs=pl.BlockSpec((tm, v), lambda i: (i, 0)),
        compiler_params=pltpu.CompilerParams(
            # Row tiles are independent: lets v7x shard them over its 2 TCs.
            dimension_semantics=("parallel",),
        ),
        cost_estimate=pl.CostEstimate(
            flops=2 * n_pad * v * v,
            transcendentals=0,
            bytes_accessed=n_pad * v * table.dtype.itemsize
            + v * v * table.dtype.itemsize
            + n_pad * 4,
        ),
    )(idx_p, table)
    return out[:n]


# -----------------------------------------------------------------------------
# Path 2: large vocab -- batched DMA row gather (scalar-prefetched indices).
# -----------------------------------------------------------------------------
def _embed_gather(idx_flat, table, row_batch=16, max_chunk_rows=32768):
    n = idx_flat.shape[0]
    vp = table.shape[1]

    # Chunk the scalar-prefetch index array so SMEM stays bounded
    # (1-D SMEM pads to next_pow2(4N) bytes).
    if n > max_chunk_rows:
        outs = [
            _embed_gather(
                idx_flat[i : i + max_chunk_rows], table, row_batch, max_chunk_rows
            )
            for i in range(0, n, max_chunk_rows)
        ]
        return jnp.concatenate(outs, axis=0)

    r = min(row_batch, _round_up(n, 8))
    n_pad = _round_up(n, r)
    idx_p = jnp.pad(idx_flat, (0, n_pad - n))  # pad value 0 is a valid row

    def kernel(idx_ref, table_hbm, out_ref, gbuf, sems):
        # idx_ref:   (n_pad,) int32 in SMEM (scalar prefetch)
        # table_hbm: (V, Vp) ref left in HBM (memory_space=pl.ANY)
        # out_ref:   (R, Vp) VMEM output block
        # gbuf:      (R, Vp) VMEM gather slab
        # sems:      (R,) DMA semaphores
        base = pl.program_id(0) * r
        copies = []
        # Issue all R row gathers first (R DMAs in flight hides HBM latency),
        # then wait; the (R, Vp) slab writes back as one lane-dense block.
        for j in range(r):
            cp = pltpu.make_async_copy(
                table_hbm.at[pl.ds(idx_ref[base + j], 1), :],
                gbuf.at[pl.ds(j, 1), :],
                sems.at[j],
            )
            cp.start()
            copies.append(cp)
        for cp in copies:
            cp.wait()
        out_ref[...] = gbuf[...]

    out = pl.pallas_call(
        kernel,
        out_shape=jax.ShapeDtypeStruct((n_pad, vp), table.dtype),
        grid_spec=pltpu.PrefetchScalarGridSpec(
            num_scalar_prefetch=1,
            grid=(n_pad // r,),
            in_specs=[pl.BlockSpec(memory_space=pl.ANY)],
            out_specs=pl.BlockSpec((r, vp), lambda i, idx_ref: (i, 0)),
            scratch_shapes=[
                pltpu.VMEM((r, vp), table.dtype),
                pltpu.SemaphoreType.DMA((r,)),
            ],
        ),
        compiler_params=pltpu.CompilerParams(
            # Disjoint output slabs per step -> safe to shard over v7x's 2 TCs.
            dimension_semantics=("parallel",),
        ),
        cost_estimate=pl.CostEstimate(
            flops=0,
            transcendentals=0,
            bytes_accessed=2 * n_pad * vp * table.dtype.itemsize + n_pad * 4,
        ),
    )(idx_p, table)
    return out[:n]


# -----------------------------------------------------------------------------
# Wrapper: TwoGram.forward
# -----------------------------------------------------------------------------
def two_gram_forward(
    inp,
    table,
    hidden,
    *,
    max_row_tile=1024,
    gather_threshold=256,
    row_batch=16,
    force_path=None,
):
    """Pallas equivalent of TwoGram.forward(inp, hidden).

    inp:    integer (B, S) token ids in [0, n_classes)
    table:  (n_classes, n_classes) embedding weight
    hidden: passed through unchanged (TwoGram keeps an empty hidden state)
    returns (x, hidden) with x: (B, S, n_classes) in table.dtype
    """
    b, s = inp.shape
    v = table.shape[0]
    n = b * s
    # PyTorch uses int64 ids; int32 is exact for any vocab < 2**31.
    # Clamp so no out-of-bounds DMA / all-zero row can occur.
    idx_flat = jnp.clip(inp.reshape(n).astype(jnp.int32), 0, v - 1)

    # Pad V up to a lane multiple so every output store / row DMA is lane-dense.
    vp = _round_up(v, 128)

    path = force_path or ("matmul" if v <= gather_threshold else "gather")
    if path == "matmul":
        tab = table if vp == v else jnp.pad(table, ((0, vp - v), (0, vp - v)))
        out_flat = _embed_matmul(idx_flat, tab, max_row_tile)
    else:
        tab = table if vp == v else jnp.pad(table, ((0, 0), (0, vp - v)))
        out_flat = _embed_gather(idx_flat, tab, row_batch)

    return out_flat[:, :v].reshape(b, s, v), hidden


if __name__ == "__main__":
    key = jax.random.PRNGKey(0)

    def run_case(n_classes, batch, seq, k):
        k_tab, k_idx = jax.random.split(k)
        # Deterministic "nn.Embedding(n_classes, n_classes)" weight (N(0,1)).
        table = jax.random.normal(k_tab, (n_classes, n_classes), dtype=jnp.float32)
        inp = jax.random.randint(k_idx, (batch, seq), 0, n_classes, dtype=jnp.int32)
        hidden = []  # TwoGram.init_hidden returns an empty list
        ref = table[inp]

        for path in ("matmul", "gather"):
            x, hidden_out = two_gram_forward(inp, table, hidden, force_path=path)
            x = jax.block_until_ready(x)
            assert x.shape == (batch, seq, n_classes), (path, x.shape)
            assert x.dtype == jnp.float32
            assert hidden_out == []
            assert bool(jnp.allclose(x, ref, atol=1e-6, rtol=1e-6)), path

    k1, k2 = jax.random.split(key)
    # Small, module-consistent shapes: vocab of 128 classes, batch=2, seq=8.
    run_case(n_classes=128, batch=2, seq=8, k=k1)
    # Non-lane-multiple vocab + multi-step gather grid for padding coverage.
    run_case(n_classes=100, batch=4, seq=10, k=k2)

    print("KERNEL_OK")
</pallas_src>

<mosaic_0001>
module attributes {stable_mosaic.version = 11 : i64} {
  func.func @_onehot_matmul_kernel(%arg0: i32, %arg1: memref<16x1xi32, #tpu.memory_space<vmem>>, %arg2: memref<128x128xf32, #tpu.memory_space<vmem>>, %arg3: memref<16x128xf32, #tpu.memory_space<vmem>>) attributes {dimension_semantics = [#tpu.dimension_semantics<parallel>], iteration_bounds = array<i64: 1>, scalar_prefetch = 0 : i64, scratch_operands = 0 : i64, tpu.core_type = #tpu.core_type<tc>, window_params = [{transform_indices = @transform_0, window_bounds = array<i64: 16, 1>}, {pipeline_mode = #tpu.pipeline_mode<synchronous>, transform_indices = @transform_1, window_bounds = array<i64: 128, 128>}, {transform_indices = @transform_2, window_bounds = array<i64: 16, 128>}]} {
    %0 = tpu.iota {dimensions = array<i32: 1>} : vector<16x128xi32>
    %c0 = arith.constant 0 : index
    %c0_0 = arith.constant 0 : index
    %1 = vector.load %arg1[%c0, %c0_0] : memref<16x1xi32, #tpu.memory_space<vmem>>, vector<16x1xi32>
    %2 = vector.broadcast %1 : vector<16x1xi32> to vector<16x128xi32>
    %3 = arith.cmpi eq, %0, %2 : vector<16x128xi32>
    %4 = arith.extui %3 : vector<16x128xi1> to vector<16x128xi32>
    %5 = arith.sitofp %4 : vector<16x128xi32> to vector<16x128xf32>
    %c0_1 = arith.constant 0 : index
    %c0_2 = arith.constant 0 : index
    %6 = vector.load %arg2[%c0_1, %c0_2] : memref<128x128xf32, #tpu.memory_space<vmem>>, vector<128x128xf32>
    %cst = arith.constant dense<0.000000e+00> : vector<16x128xf32>
    %7 = tpu.matmul %5, %6, %cst {dimension_numbers = #tpu.dot_dimension_numbers<[1], [0], [0], [1], [0, 0, 1, 1], [], []>} : vector<16x128xf32>, vector<128x128xf32>, vector<16x128xf32> -> vector<16x128xf32>
    %c0_3 = arith.constant 0 : index
    %c0_4 = arith.constant 0 : index
    %8 = vector.load %arg3[%c0_3, %c0_4] : memref<16x128xf32, #tpu.memory_space<vmem>>, vector<16x128xf32>
    tpu.vector_store %arg3[%c0_3, %c0_4], %7 {strides = array<i32>} : memref<16x128xf32, #tpu.memory_space<vmem>>, vector<16x128xf32>,
    return
  }
  func.func @transform_0(%arg0: i32) -> (i32, i32) {
    %c0_i32 = arith.constant 0 : i32
    %c0_i32_0 = arith.constant 0 : i32
    return %arg0, %c0_i32 : i32, i32
  }
  func.func @transform_1(%arg0: i32) -> (i32, i32) {
    %c0_i32 = arith.constant 0 : i32
    %c0_i32_0 = arith.constant 0 : i32
    %c0_i32_1 = arith.constant 0 : i32
    return %c0_i32, %c0_i32_0 : i32, i32
  }
  func.func @transform_2(%arg0: i32) -> (i32, i32) {
    %c0_i32 = arith.constant 0 : i32
    %c0_i32_0 = arith.constant 0 : i32
    return %arg0, %c0_i32 : i32, i32
  }
}

</mosaic_0001>

<bundles_post_ra>
// kernel: tpu_custom_call.1
= control target key start
LH: loop header
LB: loop body
LE: loop exit
PB: predicated region body
PF: predicated region fallthrough
CT: control target
= control target key end

     0   :  { %7 = vsyncpa [#allocation3], 0  ;;  %s299_s0 = inlined_call_operand.vmem [shape: s32[16,1], index: 0, kind: input, shape index: {}]   ;;  %s300_s1 = inlined_call_operand.hbm [shape: f32[128,128], index: 1, kind: input, shape index: {}]   ;;  %s301_s2 = inlined_call_operand.hbm [shape: f32[16,128], index: 2, kind: output, shape index: {}]  }
   0x1   :  { %8 = vsyncpa [#allocation4], 0  ;;  %s260_s9 = smov [#allocation2]  }
   0x2   :  { %s16_s10 = sshll.u32 %s260_s9, 4  ;;  %s17_s10 = int_to_ptr.vmem [resolvable:$true] %s16_s10 }
   0x3   :  { %s224_s11 = scalar_lea.vmem %s17_s10, 2048  ;;  %p229_p1 = scmp.lt.s32.totalorder %s17_s10, %s17_s10 }
   0x4   :  { %p225_p0 = scmp.ne.s32.totalorder %s17_s10, %s224_s11  ;;  %p230_p2 = scmp.lt.s32.totalorder %s224_s11, %s224_s11 }
   0x6   :  { %p231_p3 = por %p230_p2, %p229_p1 }
   0x8   :  { %p232_p4 = pnand %p231_p3, %p225_p0 }
   0xa   :  { %235 = shalt.err (!%p232_p4)
}
   0xb   :  { %s261_s12 = smov 128   ;;  %s262_s13 = smov 8  }
   0xc   :  { %22 = dma.hbm_to_vmem [thread:$0]  %s300_s1, 2048, %s17_s10, [#allocation3], %s261_s12, %s261_s12, %s262_s13  }
   0xd   :  { %256 = dma.done.wait [#allocation3], 2048  }
   0xe   :  { %257 = vsyncadd [#allocation3], 4294965248  ;;  %v263_v0 = vmov 0   ;;  %v28_v1 = vld [vmem:[%s299_s0] sm:$0xff]  ;;  %v57_v2 = vld [vmem:[#allocation2 + $0x78] sm:$0xff]  ;;  %v26_v19 = vlaneseq  ;;  %v264_v22 = vmov 1.0  }
   0xf   :  { %215 = vset.pattern.permute.xlu0 %v263_v0  ;;  %174 = vmatprep.subr.mxu0 %v57_v2  ;;  %v56_v3 = vld [vmem:[#allocation2 + $0x70] sm:$0xff]  ;;  %v29_v4 = vld [vmem:[%s299_s0 + $0x8] sm:$0xff]  ;;  %v54_v6 = vld [vmem:[#allocation2 + $0x60] sm:$0xff]  ;;  %s265_s0 = smov [#allocation5]  }
  0x10   :  { %31 = vperm.xlu0 %215, %v28_v1   ;;  %175 = vmatpush3.msra.mxu0 %v57_v2  ;;  %v55_v5 = vld [vmem:[#allocation2 + $0x68] sm:$0xff]  ;;  %v53_v7 = vld [vmem:[#allocation2 + $0x58] sm:$0xff]  ;;  %v52_v8 = vld [vmem:[#allocation2 + $0x50] sm:$0xff]  ;;  %v27_v20 = vand.u32 127, %v26_v19  ;;  %s140_s1 = sshll.u32 %s265_s0, 4  ;;  %s141_s1 = int_to_ptr.vmem [resolvable:$true] %s140_s1 }
  0x11   :  { %176 = vmatprep.subr.mxu0 %v56_v3  ;;  %v51_v9 = vld [vmem:[#allocation2 + $0x48] sm:$0xff]  ;;  %v50_v10 = vld [vmem:[#allocation2 + $0x40] sm:$0xff]  ;;  %v49_v11 = vld [vmem:[#allocation2 + $0x38] sm:$0xff]  ;;  %s236_s20 = scalar_lea.vmem %s141_s1, 256  ;;  %p241_p6 = scmp.lt.s32.totalorder %s141_s1, %s141_s1 }
  0x12   :  { %177 = vmatpush3.msra.mxu0 %v56_v3  ;;  %v48_v12 = vld [vmem:[#allocation2 + $0x30] sm:$0xff]  ;;  %v47_v13 = vld [vmem:[#allocation2 + $0x28] sm:$0xff]  ;;  %v46_v14 = vld [vmem:[#allocation2 + $0x20] sm:$0xff]  ;;  %p237_p5 = scmp.ne.s32.totalorder %s141_s1, %s236_s20  ;;  %p242_p7 = scmp.lt.s32.totalorder %s236_s20, %s236_s20 }
  0x13   :  { %178 = vmatprep.subr.mxu0 %v55_v5  ;;  %v45_v15 = vld [vmem:[#allocation2 + $0x18] sm:$0xff]  ;;  %v44_v16 = vld [vmem:[#allocation2 + $0x10] sm:$0xff]  ;;  %v43_v17 = vld [vmem:[#allocation2 + $0x8] sm:$0xff] }
  0x14   :  { %34 = vperm.xlu0 %215, %v29_v4   ;;  %179 = vmatpush3.msra.mxu0 %v55_v5  ;;  %v42_v18 = vld [vmem:[#allocation2] sm:$0xff]  ;;  %p243_p8 = por %p242_p7, %p241_p6 }
  0x15   :  { %180 = vmatprep.subr.mxu0 %v54_v6 }
  0x16   :  { %181 = vmatpush3.msra.mxu0 %v54_v6  ;;  %p244_p9 = pnand %p243_p8, %p237_p5 }
  0x17   :  { %182 = vmatprep.subr.mxu0 %v53_v7 }
  0x18   :  { %183 = vmatpush3.msra.mxu0 %v53_v7 }
  0x19   :  { %184 = vmatprep.subr.mxu0 %v52_v8 }
  0x1a   :  { %185 = vmatpush3.msra.mxu0 %v52_v8 }
  0x1b   :  { %186 = vmatprep.subr.mxu0 %v51_v9 }
  0x1c   :  { %187 = vmatpush3.msra.mxu0 %v51_v9 }
  0x1d   :  { %188 = vmatprep.subr.mxu0 %v50_v10 }
  0x1e   :  { %189 = vmatpush3.msra.mxu0 %v50_v10 }
  0x1f   :  { %190 = vmatprep.subr.mxu0 %v49_v11 }
  0x20   :  { %191 = vmatpush3.msra.mxu0 %v49_v11 }
  0x21   :  { %192 = vmatprep.subr.mxu0 %v48_v12 }
  0x22   :  { %193 = vmatpush3.msra.mxu0 %v48_v12 }
  0x23   :  { %194 = vmatprep.subr.mxu0 %v47_v13 }
  0x24   :  { %195 = vmatpush3.msra.mxu0 %v47_v13 }
  0x25   :  { %196 = vmatprep.subr.mxu0 %v46_v14 }
  0x26   :  { %197 = vmatpush3.msra.mxu0 %v46_v14 }
  0x27   :  { %198 = vmatprep.subr.mxu0 %v45_v15 }
  0x28   :  { %199 = vmatpush3.msra.mxu0 %v45_v15 }
  0x29   :  { %200 = vmatprep.subr.mxu0 %v44_v16 }
  0x2a   :  { %201 = vmatpush3.msra.mxu0 %v44_v16 }
  0x2b   :  { %202 = vmatprep.subr.mxu0 %v43_v17 }
  0x2c   :  { %203 = vmatpush3.msra.mxu0 %v43_v17 }
  0x2d   :  { %204 = vmatprep.subr.mxu0 %v42_v18 }
  0x2e   :  { %205 = vmatpush3.msra.mxu0 %v42_v18 }
  0x8b   :  { %v32_v21 = vpop.permute.xlu0 %31 }
  0x8c   :  { %vm36_vm0 = vcmp.eq.s32.totalorder %v27_v20, %v32_v21 }
  0x8d   :  { %206 = vmatprep.mubr.msk.f32.mxu0 %vm36_vm0, %v264_v22 }
  0x8f   :  { %v35_v23 = vpop.permute.xlu0 %34 }
  0x90   :  { %vm37_vm1 = vcmp.eq.s32.totalorder %v27_v20, %v35_v23 }
  0x91   :  { %207 = vmatmul.mubr.msk.f32.vlgmr.msra.gmra.mxu0 %vm37_vm1, %v264_v22 }
 0x151   :  { %v208_v24 = vpop.f32.mrf.mxu0 }
 0x152   :  { %134 = vst [vmem:[#allocation5 + $0x8] sm:$0xff] %v208_v24 }
 0x153   :  { %v124_v25 = vpop.f32.mrf.mxu0 }
 0x154   :  { %133 = vst [vmem:[#allocation5] sm:$0xff] %v124_v25 }
 0x155   :  { %247 = shalt.err (!%p244_p9)
}
 0x156   :  { %146 = dma.vmem_to_hbm [thread:$0]  %s141_s1, 256, %s301_s2, [#allocation4], %s261_s12, %s261_s12, %s262_s13  }
 0x157   :  { %258 = dma.done.wait [#allocation4], 256  }
 0x158   :  { %259 = vsyncadd [#allocation4], 4294967040 }
 0x159   :  { %150 = vsyncpa [#allocation3], 1 }
 0x15a   :  { %151 = vsyncpa [#allocation4], 1 }

</bundles_post_ra>
